<compile_context>
chip_gen: v7x
topology: tpu7x:2x2x1
jax: 0.10.0
libtpu: 0.0.40
codegen_flags: <defaults>
</compile_context>

<pallas_src>
import functools

import numpy as np
import jax
import jax.numpy as jnp
from jax.experimental import pallas as pl
from jax.experimental.pallas import tpu as pltpu


# --------------------------------------------------------------------------
# In-kernel math helpers
# --------------------------------------------------------------------------
def _erf(v):
    # Abramowitz & Stegun 7.1.26, |err| < 1.5e-7 (f32 noise level).
    a1, a2, a3, a4, a5 = (0.254829592, -0.284496736, 1.421413741,
                          -1.453152027, 1.061405429)
    p = 0.3275911
    s = jnp.where(v >= 0.0, 1.0, -1.0)
    av = jnp.abs(v)
    t = 1.0 / (1.0 + p * av)
    poly = ((((a5 * t + a4) * t + a3) * t + a2) * t + a1) * t
    return s * (1.0 - poly * jnp.exp(-av * av))


def _gelu_exact(v):
    # PyTorch nn.GELU() default: exact erf-based GELU.
    return 0.5 * v * (1.0 + _erf(v * np.float32(1.0 / np.sqrt(2.0))))


# --------------------------------------------------------------------------
# Pallas kernel: one (TB, N, D) batch tile per grid step
# --------------------------------------------------------------------------
def _ehia_kernel(x_ref, wq_ref, bqw_ref, bq_ref, wg_ref, wk_ref, bk_ref,
                 wfc_ref, bfc_ref, w2vec_ref, b2bar_ref,
                 wp_ref, bp_ref, lnw_ref, lnb_ref,
                 out_ref, *, num_heads, in_dims):
    TB, N, D = x_ref.shape
    H = num_heads

    x3 = x_ref[...]                                                  # (TB,N,D) bf16
    x2 = x3.reshape(TB * N, D)

    # ---- K projection over all tokens: big bf16 MXU matmul, f32 acc --------
    k2 = (jnp.dot(x2, wk_ref[...], preferred_element_type=jnp.float32)
          + bk_ref[...])                                             # (TB*N, D)
    k3 = k2.reshape(TB, N, D)

    # ---- token reductions of x replace the full-token Q projection ---------
    # qw  = scale * sum_n w_g[n] q_n = (sum_n scale*w_g[n] x_n) @ Wq^T + bq_w
    # d0  = mean_n q_n             = (mean_n x_n)              @ Wq^T + bq
    x3f = x3.astype(jnp.float32)
    xw = jnp.sum(x3f * wg_ref[...], axis=1)                          # (TB, D)
    xm = jnp.mean(x3f, axis=1)                                       # (TB, D)
    wq = wq_ref[...]                                                 # (D, D) f32
    qw = jnp.dot(xw, wq, preferred_element_type=jnp.float32) + bqw_ref[...]
    d0 = jnp.dot(xm, wq, preferred_element_type=jnp.float32) + bq_ref[...]

    # ---- channel attention: A = softmax_d(qw),  G = A * Σ_n k_n -------------
    m = jnp.max(qw, axis=-1, keepdims=True)
    e = jnp.exp(qw - m)
    attn = e / jnp.sum(e, axis=-1, keepdims=True)                    # softmax over D
    g_vec = attn * jnp.sum(k3, axis=1)                               # (TB, D)

    # ---- d_avg gating branch (shared (in_dims, D) fc weight) ----------------
    wfc = wfc_ref[...]                                               # (in_dims, D) bf16
    bfc = bfc_ref[...]                                               # (1, D) f32
    w2 = w2vec_ref[...]                                              # (1, D) f32
    sp_parts = []
    for h in range(H):                                               # static unroll, H small
        dh = d0[:, h * in_dims:(h + 1) * in_dims].astype(wfc.dtype)  # (TB, in_dims)
        u = _gelu_exact(jnp.dot(dh, wfc, preferred_element_type=jnp.float32)
                        + bfc)                                       # (TB, D)
        uw = u * w2                                                  # fc2+mean fold
        acc = uw[:, 0:in_dims]
        for c in range(1, H):
            acc = acc + uw[:, c * in_dims:(c + 1) * in_dims]
        sp_parts.append(acc)                                         # (TB, in_dims)
    s_pre = jnp.concatenate(sp_parts, axis=-1) + b2bar_ref[...]      # (TB, D)
    sig = 1.0 / (1.0 + jnp.exp(-s_pre))                              # sigmoid
    g_vec = g_vec * sig                                              # (TB, D)

    # ---- LayerNorm(k) over D (eps = 1e-5, biased variance) ------------------
    mu = jnp.mean(k2, axis=-1, keepdims=True)
    var = jnp.mean(jnp.square(k2 - mu), axis=-1, keepdims=True)
    ln2 = (k2 - mu) * jax.lax.rsqrt(var + 1e-5) * lnw_ref[...] + lnb_ref[...]

    # ---- out = Proj(G * k) + LayerNorm(k) ------------------------------------
    gk2 = (k3 * g_vec.reshape(TB, 1, D)).reshape(TB * N, D).astype(wp_ref.dtype)
    out2 = (jnp.dot(gk2, wp_ref[...], preferred_element_type=jnp.float32)
            + bp_ref[...] + ln2)                                     # (TB*N, D)
    out_ref[...] = out2.reshape(TB, N, D).astype(out_ref.dtype)


# --------------------------------------------------------------------------
# Wrapper
# --------------------------------------------------------------------------
def _pick_batch_tile(batch, n):
    """Largest divisor of `batch` keeping the collapsed M dim TB*N <= 512."""
    if n % 8 != 0:
        return 1            # keep the (TB,N,D)<->(TB*N,D) collapse sublane-aligned
    tb = 1
    for cand in range(1, batch + 1):
        if batch % cand == 0 and cand * n <= 512 and cand <= 64:
            tb = cand
    return tb


def _vmem_limit_bytes(tb, n, d, in_dims):
    weights = 2 * d * d * 2 + d * d * 4 + in_dims * d * 2    # wk/wp bf16, wq f32, wfc bf16
    weights += (8 * d + n + 4) * 4                           # f32 biases / vectors
    io_blocks = tb * n * d * (2 + 4)                         # x (bf16) + out (f32)
    est = 2 * (weights + io_blocks) + 10 * tb * n * d * 4 + (4 << 20)
    return int(min(64 << 20, max(16 << 20, est)))            # 64 MiB cap keeps v7x happy


def ehia_attention(x, kp, num_heads, compute_dtype=jnp.bfloat16):
    B, N, D = x.shape
    H = num_heads
    in_dims = D // H
    TB = _pick_batch_tile(B, N)
    kernel = functools.partial(_ehia_kernel, num_heads=H, in_dims=in_dims)

    def rep(shape):                      # replicated (grid-constant) weight block
        return pl.BlockSpec(shape, lambda b: (0, 0))

    in_specs = [
        pl.BlockSpec((TB, N, D), lambda b: (b, 0, 0)),   # x (bf16)
        rep((D, D)),                                     # Wq^T (f32, small matmuls)
        rep((1, D)), rep((1, D)),                        # bq_w (scaled), bq
        rep((N, 1)),                                     # w_g * scale
        rep((D, D)), rep((1, D)),                        # fc_k (W^T bf16, bias f32)
        rep((in_dims, D)), rep((1, D)),                  # fc (shared, column-permuted)
        rep((1, D)), rep((1, 1)),                        # fc2+mean fold (w2vec, b2bar)
        rep((D, D)), rep((1, D)),                        # Proj (W^T bf16, bias f32)
        rep((1, D)), rep((1, D)),                        # LayerNorm (w, b)
    ]
    grid_spec = pltpu.PrefetchScalarGridSpec(
        num_scalar_prefetch=0,
        grid=(B // TB,),
        in_specs=in_specs,
        out_specs=pl.BlockSpec((TB, N, D), lambda b: (b, 0, 0)),
    )
    return pl.pallas_call(
        kernel,
        out_shape=jax.ShapeDtypeStruct((B, N, D), jnp.float32),
        grid_spec=grid_spec,
        compiler_params=pltpu.CompilerParams(
            dimension_semantics=("parallel",),
            vmem_limit_bytes=_vmem_limit_bytes(TB, N, D, in_dims)),
    )(x.astype(compute_dtype),
      kp["wq_t"], kp["bq_w"], kp["bq"], kp["wg_s"],
      kp["wk_t"], kp["bk"],
      kp["wfc_p"], kp["bfc_p"], kp["w2vec"], kp["b2bar"],
      kp["wp_t"], kp["bp"], kp["ln_w"], kp["ln_b"])


# --------------------------------------------------------------------------
# Parameter construction (deterministic, shapes from the module __init__)
# --------------------------------------------------------------------------
def init_params(key, num_patches, dim, num_heads):
    in_dims = dim // num_heads
    ks = jax.random.split(key, 6)

    def linear(k, fan_in, fan_out):
        k1, k2 = jax.random.split(k)
        bound = 1.0 / np.sqrt(fan_in)
        w = jax.random.uniform(k1, (fan_out, fan_in), jnp.float32, -bound, bound)
        b = jax.random.uniform(k2, (fan_out,), jnp.float32, -bound, bound)
        return w, b

    wq, bq = linear(ks[0], dim, dim)                  # fc_q
    wk, bk = linear(ks[1], dim, dim)                  # fc_k
    wp, bp = linear(ks[2], dim, dim)                  # Proj
    wfc, bfc = linear(ks[3], in_dims, dim)            # fc
    wfc2, bfc2 = linear(ks[4], num_heads, num_heads)  # fc2
    w_g = jax.random.normal(ks[5], (num_patches, 1), jnp.float32)
    return dict(wq=wq, bq=bq, wk=wk, bk=bk, wp=wp, bp=bp,
                wfc=wfc, bfc=bfc, wfc2=wfc2, bfc2=bfc2, w_g=w_g,
                ln_w=jnp.ones((dim,), jnp.float32),
                ln_b=jnp.zeros((dim,), jnp.float32))


def prepare_kernel_params(p, num_patches, dim, num_heads,
                          compute_dtype=jnp.bfloat16):
    """Wrapper-side glue:
       * fold the softmax scale into w_g and into the q-bias contribution
         (qw = (Σ_n scale*w_g[n] x_n) @ Wq^T + scale*(Σ w_g)*bq);
       * column-permute fc so the post-GELU fc2+mean reduction becomes a sum
         over H contiguous lane blocks (permuted column c*in_dims+t maps to
         original fc output row t*H+c);
       * fold fc2+mean into a per-block weight vector w2vec and scalar b2bar.
    """
    H, D, N = num_heads, dim, num_patches
    ind = D // H
    scale = float(N) ** (-0.5)

    wq = np.asarray(p["wq"], np.float32)                            # (D, D)
    bq = np.asarray(p["bq"], np.float32)
    wk = np.asarray(p["wk"], np.float32)
    bk = np.asarray(p["bk"], np.float32)
    w_g = np.asarray(p["w_g"], np.float32).reshape(N, 1)

    wg_s = w_g * np.float32(scale)                                  # (N, 1)
    bq_w = (np.float32(w_g.sum()) * np.float32(scale)) * bq         # (D,)

    wfc = np.asarray(p["wfc"], np.float32)                          # (D, in_dims)
    bfc = np.asarray(p["bfc"], np.float32)                          # (D,)
    perm = np.empty((D,), np.int64)
    for c in range(H):
        for t in range(ind):
            perm[c * ind + t] = t * H + c
    wfc_p = wfc[perm, :].T                                          # (in_dims, D)
    bfc_p = bfc[perm].reshape(1, D)

    wfc2 = np.asarray(p["wfc2"], np.float32)                        # (H, H)
    bfc2 = np.asarray(p["bfc2"], np.float32)
    w2bar = wfc2.mean(axis=0)                                       # (H,)
    w2vec = np.repeat(w2bar, ind).reshape(1, D).astype(np.float32)
    b2bar = np.array([[bfc2.mean()]], np.float32)

    wp_t = np.asarray(p["wp"], np.float32).T                        # (D, D)

    return dict(
        wq_t=jnp.asarray(wq.T, jnp.float32),
        bq_w=jnp.asarray(bq_w.reshape(1, D), jnp.float32),
        bq=jnp.asarray(bq.reshape(1, D), jnp.float32),
        wg_s=jnp.asarray(wg_s, jnp.float32),
        wk_t=jnp.asarray(wk.T, compute_dtype),
        bk=jnp.asarray(bk.reshape(1, D), jnp.float32),
        wfc_p=jnp.asarray(wfc_p, compute_dtype),
        bfc_p=jnp.asarray(bfc_p, jnp.float32),
        w2vec=jnp.asarray(w2vec, jnp.float32),
        b2bar=jnp.asarray(b2bar, jnp.float32),
        wp_t=jnp.asarray(wp_t, compute_dtype),
        bp=jnp.asarray(np.asarray(p["bp"], np.float32).reshape(1, D)),
        ln_w=jnp.asarray(np.asarray(p["ln_w"], np.float32).reshape(1, D)),
        ln_b=jnp.asarray(np.asarray(p["ln_b"], np.float32).reshape(1, D)),
    )


# --------------------------------------------------------------------------
# Pure-JAX reference mirroring the PyTorch forward literally (f32)
# --------------------------------------------------------------------------
def reference(x, p, num_heads):
    B, N, D = x.shape
    in_dims = D // num_heads
    scale = float(N) ** (-0.5)
    q = x @ p["wq"].T + p["bq"]
    k = x @ p["wk"].T + p["bk"]
    x_t = jnp.swapaxes(q, 1, 2)                       # (B, D, N)
    qw = jnp.swapaxes(x_t @ p["w_g"], 1, 2)           # (B, 1, D)
    A = jax.nn.softmax(qw * scale, axis=-1)
    G = jnp.sum(A * k, axis=1)                        # (B, D)
    d_avg = jnp.mean(x_t, axis=2)                     # AdaptiveAvgPool2d((None,1))
    d_avg = d_avg.reshape(B, num_heads, in_dims)
    d_avg = jax.nn.gelu(d_avg @ p["wfc"].T + p["bfc"], approximate=False)
    d_avg = d_avg.reshape(B, -1, num_heads)           # (B, D, H)
    d_avg = d_avg @ p["wfc2"].T + p["bfc2"]
    d_avg = jax.nn.sigmoid(jnp.mean(d_avg, axis=-1))  # (B, D)
    G = G * d_avg
    Gb = jnp.broadcast_to(G[:, None, :], (B, N, D))
    mu = jnp.mean(k, axis=-1, keepdims=True)
    var = jnp.mean((k - mu) ** 2, axis=-1, keepdims=True)
    ln = (k - mu) / jnp.sqrt(var + 1e-5) * p["ln_w"] + p["ln_b"]
    return (Gb * k) @ p["wp"].T + p["bp"] + ln


# --------------------------------------------------------------------------
if __name__ == "__main__":
    B, N, D, H = 2, 8, 32, 2          # batch, num_patches, dim, num_heads
    key = jax.random.PRNGKey(0)
    kx, kparam = jax.random.split(key)
    x = jax.random.normal(kx, (B, N, D), jnp.float32)

    params = init_params(kparam, N, D, H)
    kernel_params = prepare_kernel_params(params, N, D, H)

    out = ehia_attention(x, kernel_params, H)
    out = jax.block_until_ready(out)

    ref = reference(x, params, H)
    assert out.shape == (B, N, D)
    # bf16 matmul inputs (f32 accumulation) -> slightly looser tolerance.
    np.testing.assert_allclose(np.asarray(out), np.asarray(ref),
                               rtol=1e-2, atol=1e-2)
    print("KERNEL_OK")
</pallas_src>

<mosaic_0001>
module attributes {stable_mosaic.version = 11 : i64} {
  func.func @_ehia_kernel(%arg0: i32, %arg1: memref<2x8x32xbf16, #tpu.memory_space<vmem>>, %arg2: memref<32x32xf32, #tpu.memory_space<vmem>>, %arg3: memref<1x32xf32, #tpu.memory_space<vmem>>, %arg4: memref<1x32xf32, #tpu.memory_space<vmem>>, %arg5: memref<8x1xf32, #tpu.memory_space<vmem>>, %arg6: memref<32x32xbf16, #tpu.memory_space<vmem>>, %arg7: memref<1x32xf32, #tpu.memory_space<vmem>>, %arg8: memref<16x32xbf16, #tpu.memory_space<vmem>>, %arg9: memref<1x32xf32, #tpu.memory_space<vmem>>, %arg10: memref<1x32xf32, #tpu.memory_space<vmem>>, %arg11: memref<1x1xf32, #tpu.memory_space<vmem>>, %arg12: memref<32x32xbf16, #tpu.memory_space<vmem>>, %arg13: memref<1x32xf32, #tpu.memory_space<vmem>>, %arg14: memref<1x32xf32, #tpu.memory_space<vmem>>, %arg15: memref<1x32xf32, #tpu.memory_space<vmem>>, %arg16: memref<2x8x32xf32, #tpu.memory_space<vmem>>) attributes {dimension_semantics = [#tpu.dimension_semantics<parallel>], iteration_bounds = array<i64: 1>, scalar_prefetch = 0 : i64, scratch_operands = 0 : i64, tpu.core_type = #tpu.core_type<tc>, window_params = [{transform_indices = @transform_0, window_bounds = array<i64: 2, 8, 32>}, {pipeline_mode = #tpu.pipeline_mode<synchronous>, transform_indices = @transform_1, window_bounds = array<i64: 32, 32>}, {pipeline_mode = #tpu.pipeline_mode<synchronous>, transform_indices = @transform_2, window_bounds = array<i64: 1, 32>}, {pipeline_mode = #tpu.pipeline_mode<synchronous>, transform_indices = @transform_3, window_bounds = array<i64: 1, 32>}, {pipeline_mode = #tpu.pipeline_mode<synchronous>, transform_indices = @transform_4, window_bounds = array<i64: 8, 1>}, {pipeline_mode = #tpu.pipeline_mode<synchronous>, transform_indices = @transform_5, window_bounds = array<i64: 32, 32>}, {pipeline_mode = #tpu.pipeline_mode<synchronous>, transform_indices = @transform_6, window_bounds = array<i64: 1, 32>}, {pipeline_mode = #tpu.pipeline_mode<synchronous>, transform_indices = @transform_7, window_bounds = array<i64: 16, 32>}, {pipeline_mode = #tpu.pipeline_mode<synchronous>, transform_indices = @transform_8, window_bounds = array<i64: 1, 32>}, {pipeline_mode = #tpu.pipeline_mode<synchronous>, transform_indices = @transform_9, window_bounds = array<i64: 1, 32>}, {pipeline_mode = #tpu.pipeline_mode<synchronous>, transform_indices = @transform_10, window_bounds = array<i64: 1, 1>}, {pipeline_mode = #tpu.pipeline_mode<synchronous>, transform_indices = @transform_11, window_bounds = array<i64: 32, 32>}, {pipeline_mode = #tpu.pipeline_mode<synchronous>, transform_indices = @transform_12, window_bounds = array<i64: 1, 32>}, {pipeline_mode = #tpu.pipeline_mode<synchronous>, transform_indices = @transform_13, window_bounds = array<i64: 1, 32>}, {pipeline_mode = #tpu.pipeline_mode<synchronous>, transform_indices = @transform_14, window_bounds = array<i64: 1, 32>}, {transform_indices = @transform_15, window_bounds = array<i64: 2, 8, 32>}]} {
    %c0 = arith.constant 0 : index
    %c0_0 = arith.constant 0 : index
    %c0_1 = arith.constant 0 : index
    %0 = vector.load %arg1[%c0, %c0_0, %c0_1] : memref<2x8x32xbf16, #tpu.memory_space<vmem>>, vector<2x8x32xbf16>
    %1 = vector.shape_cast %0 : vector<2x8x32xbf16> to vector<16x32xbf16>
    %c0_2 = arith.constant 0 : index
    %c0_3 = arith.constant 0 : index
    %2 = vector.load %arg6[%c0_2, %c0_3] : memref<32x32xbf16, #tpu.memory_space<vmem>>, vector<32x32xbf16>
    %cst = arith.constant dense<0.000000e+00> : vector<16x32xf32>
    %3 = tpu.matmul %1, %2, %cst {dimension_numbers = #tpu.dot_dimension_numbers<[1], [0], [0], [1], [0, 0, 1, 1], [], []>} : vector<16x32xbf16>, vector<32x32xbf16>, vector<16x32xf32> -> vector<16x32xf32>
    %c0_4 = arith.constant 0 : index
    %c0_5 = arith.constant 0 : index
    %4 = vector.load %arg7[%c0_4, %c0_5] : memref<1x32xf32, #tpu.memory_space<vmem>>, vector<1x32xf32>
    %5 = vector.broadcast %4 : vector<1x32xf32> to vector<16x32xf32>
    %6 = arith.addf %3, %5 : vector<16x32xf32>
    %7 = vector.shape_cast %6 : vector<16x32xf32> to vector<2x8x32xf32>
    %8 = arith.extf %0 : vector<2x8x32xbf16> to vector<2x8x32xf32>
    %c0_6 = arith.constant 0 : index
    %c0_7 = arith.constant 0 : index
    %9 = vector.load %arg5[%c0_6, %c0_7] : memref<8x1xf32, #tpu.memory_space<vmem>>, vector<8x1xf32>
    %10 = vector.shape_cast %9 : vector<8x1xf32> to vector<1x8x1xf32>
    %11 = vector.broadcast %10 : vector<1x8x1xf32> to vector<2x8x32xf32>
    %12 = arith.mulf %8, %11 : vector<2x8x32xf32>
    %cst_8 = arith.constant dense<0.000000e+00> : vector<2x32xf32>
    %13 = vector.multi_reduction <add>, %12, %cst_8 [1] : vector<2x8x32xf32> to vector<2x32xf32>
    %cst_9 = arith.constant dense<0.000000e+00> : vector<2x32xf32>
    %14 = vector.multi_reduction <add>, %8, %cst_9 [1] : vector<2x8x32xf32> to vector<2x32xf32>
    %cst_10 = arith.constant 8.000000e+00 : f32
    %15 = vector.broadcast %cst_10 : f32 to vector<2x32xf32>
    %16 = arith.divf %14, %15 : vector<2x32xf32>
    %c0_11 = arith.constant 0 : index
    %c0_12 = arith.constant 0 : index
    %17 = vector.load %arg2[%c0_11, %c0_12] : memref<32x32xf32, #tpu.memory_space<vmem>>, vector<32x32xf32>
    %cst_13 = arith.constant dense<0.000000e+00> : vector<2x32xf32>
    %18 = tpu.matmul %13, %17, %cst_13 {dimension_numbers = #tpu.dot_dimension_numbers<[1], [0], [0], [1], [0, 0, 1, 1], [], []>} : vector<2x32xf32>, vector<32x32xf32>, vector<2x32xf32> -> vector<2x32xf32>
    %c0_14 = arith.constant 0 : index
    %c0_15 = arith.constant 0 : index
    %19 = vector.load %arg3[%c0_14, %c0_15] : memref<1x32xf32, #tpu.memory_space<vmem>>, vector<1x32xf32>
    %20 = vector.broadcast %19 : vector<1x32xf32> to vector<2x32xf32>
    %21 = arith.addf %18, %20 : vector<2x32xf32>
    %cst_16 = arith.constant dense<0.000000e+00> : vector<2x32xf32>
    %22 = tpu.matmul %16, %17, %cst_16 {dimension_numbers = #tpu.dot_dimension_numbers<[1], [0], [0], [1], [0, 0, 1, 1], [], []>} : vector<2x32xf32>, vector<32x32xf32>, vector<2x32xf32> -> vector<2x32xf32>
    %c0_17 = arith.constant 0 : index
    %c0_18 = arith.constant 0 : index
    %23 = vector.load %arg4[%c0_17, %c0_18] : memref<1x32xf32, #tpu.memory_space<vmem>>, vector<1x32xf32>
    %24 = vector.broadcast %23 : vector<1x32xf32> to vector<2x32xf32>
    %25 = arith.addf %22, %24 : vector<2x32xf32>
    %cst_19 = arith.constant dense<0xFF800000> : vector<2xf32>
    %26 = vector.multi_reduction <maximumf>, %21, %cst_19 [1] : vector<2x32xf32> to vector<2xf32>
    %27 = vector.shape_cast %26 : vector<2xf32> to vector<2x1xf32>
    %28 = vector.broadcast %27 : vector<2x1xf32> to vector<2x32xf32>
    %29 = arith.subf %21, %28 : vector<2x32xf32>
    %30 = math.exp %29 : vector<2x32xf32>
    %cst_20 = arith.constant dense<0.000000e+00> : vector<2xf32>
    %31 = vector.multi_reduction <add>, %30, %cst_20 [1] : vector<2x32xf32> to vector<2xf32>
    %32 = vector.shape_cast %31 : vector<2xf32> to vector<2x1xf32>
    %33 = vector.broadcast %32 : vector<2x1xf32> to vector<2x32xf32>
    %34 = arith.divf %30, %33 : vector<2x32xf32>
    %cst_21 = arith.constant dense<0.000000e+00> : vector<2x32xf32>
    %35 = vector.multi_reduction <add>, %7, %cst_21 [1] : vector<2x8x32xf32> to vector<2x32xf32>
    %36 = arith.mulf %34, %35 : vector<2x32xf32>
    %c0_22 = arith.constant 0 : index
    %c0_23 = arith.constant 0 : index
    %37 = vector.load %arg8[%c0_22, %c0_23] : memref<16x32xbf16, #tpu.memory_space<vmem>>, vector<16x32xbf16>
    %c0_24 = arith.constant 0 : index
    %c0_25 = arith.constant 0 : index
    %38 = vector.load %arg9[%c0_24, %c0_25] : memref<1x32xf32, #tpu.memory_space<vmem>>, vector<1x32xf32>
    %c0_26 = arith.constant 0 : index
    %c0_27 = arith.constant 0 : index
    %39 = vector.load %arg10[%c0_26, %c0_27] : memref<1x32xf32, #tpu.memory_space<vmem>>, vector<1x32xf32>
    %40 = vector.extract_strided_slice %25 {offsets = [0, 0], sizes = [2, 16], strides = [1, 1]} : vector<2x32xf32> to vector<2x16xf32>
    %41 = arith.truncf %40 : vector<2x16xf32> to vector<2x16xbf16>
    %cst_28 = arith.constant dense<0.000000e+00> : vector<2x32xf32>
    %42 = tpu.matmul %41, %37, %cst_28 {dimension_numbers = #tpu.dot_dimension_numbers<[1], [0], [0], [1], [0, 0, 1, 1], [], []>} : vector<2x16xbf16>, vector<16x32xbf16>, vector<2x32xf32> -> vector<2x32xf32>
    %43 = vector.broadcast %38 : vector<1x32xf32> to vector<2x32xf32>
    %44 = arith.addf %42, %43 : vector<2x32xf32>
    %cst_29 = arith.constant 5.000000e-01 : f32
    %45 = vector.broadcast %cst_29 : f32 to vector<2x32xf32>
    %46 = arith.mulf %45, %44 : vector<2x32xf32>
    %cst_30 = arith.constant 0.707106769 : f32
    %47 = vector.broadcast %cst_30 : f32 to vector<2x32xf32>
    %48 = arith.mulf %44, %47 : vector<2x32xf32>
    %cst_31 = arith.constant 0.000000e+00 : f32
    %49 = vector.broadcast %cst_31 : f32 to vector<2x32xf32>
    %50 = arith.cmpf oge, %48, %49 : vector<2x32xf32>
    %cst_32 = arith.constant 1.000000e+00 : f32
    %cst_33 = arith.constant -1.000000e+00 : f32
    %51 = vector.broadcast %cst_32 : f32 to vector<2x32xf32>
    %52 = vector.broadcast %cst_33 : f32 to vector<2x32xf32>
    %53 = arith.select %50, %51, %52 : vector<2x32xi1>, vector<2x32xf32>
    %54 = math.absf %48 : vector<2x32xf32>
    %cst_34 = arith.constant 0.327591091 : f32
    %55 = vector.broadcast %cst_34 : f32 to vector<2x32xf32>
    %56 = arith.mulf %55, %54 : vector<2x32xf32>
    %cst_35 = arith.constant 1.000000e+00 : f32
    %57 = vector.broadcast %cst_35 : f32 to vector<2x32xf32>
    %58 = arith.addf %57, %56 : vector<2x32xf32>
    %cst_36 = arith.constant 1.000000e+00 : f32
    %59 = vector.broadcast %cst_36 : f32 to vector<2x32xf32>
    %60 = arith.divf %59, %58 : vector<2x32xf32>
    %cst_37 = arith.constant 1.06140542 : f32
    %61 = vector.broadcast %cst_37 : f32 to vector<2x32xf32>
    %62 = arith.mulf %61, %60 : vector<2x32xf32>
    %cst_38 = arith.constant -1.45315206 : f32
    %63 = vector.broadcast %cst_38 : f32 to vector<2x32xf32>
    %64 = arith.addf %62, %63 : vector<2x32xf32>
    %65 = arith.mulf %64, %60 : vector<2x32xf32>
    %cst_39 = arith.constant 1.42141378 : f32
    %66 = vector.broadcast %cst_39 : f32 to vector<2x32xf32>
    %67 = arith.addf %65, %66 : vector<2x32xf32>
    %68 = arith.mulf %67, %60 : vector<2x32xf32>
    %cst_40 = arith.constant -0.284496725 : f32
    %69 = vector.broadcast %cst_40 : f32 to vector<2x32xf32>
    %70 = arith.addf %68, %69 : vector<2x32xf32>
    %71 = arith.mulf %70, %60 : vector<2x32xf32>
    %cst_41 = arith.constant 0.254829586 : f32
    %72 = vector.broadcast %cst_41 : f32 to vector<2x32xf32>
    %73 = arith.addf %71, %72 : vector<2x32xf32>
    %74 = arith.mulf %73, %60 : vector<2x32xf32>
    %cst_42 = arith.constant 0.000000e+00 : f32
    %75 = vector.broadcast %cst_42 : f32 to vector<2x32xf32>
    %76 = arith.subf %75, %54 : vector<2x32xf32>
    %77 = arith.mulf %76, %54 : vector<2x32xf32>
    %78 = math.exp %77 : vector<2x32xf32>
    %79 = arith.mulf %74, %78 : vector<2x32xf32>
    %cst_43 = arith.constant 1.000000e+00 : f32
    %80 = vector.broadcast %cst_43 : f32 to vector<2x32xf32>
    %81 = arith.subf %80, %79 : vector<2x32xf32>
    %82 = arith.mulf %53, %81 : vector<2x32xf32>
    %cst_44 = arith.constant 1.000000e+00 : f32
    %83 = vector.broadcast %cst_44 : f32 to vector<2x32xf32>
    %84 = arith.addf %83, %82 : vector<2x32xf32>
    %85 = arith.mulf %46, %84 : vector<2x32xf32>
    %86 = vector.broadcast %39 : vector<1x32xf32> to vector<2x32xf32>
    %87 = arith.mulf %85, %86 : vector<2x32xf32>
    %88 = vector.extract_strided_slice %87 {offsets = [0, 0], sizes = [2, 16], strides = [1, 1]} : vector<2x32xf32> to vector<2x16xf32>
    %89 = vector.extract_strided_slice %87 {offsets = [0, 16], sizes = [2, 16], strides = [1, 1]} : vector<2x32xf32> to vector<2x16xf32>
    %90 = arith.addf %88, %89 : vector<2x16xf32>
    %91 = vector.extract_strided_slice %25 {offsets = [0, 16], sizes = [2, 16], strides = [1, 1]} : vector<2x32xf32> to vector<2x16xf32>
    %92 = arith.truncf %91 : vector<2x16xf32> to vector<2x16xbf16>
    %cst_45 = arith.constant dense<0.000000e+00> : vector<2x32xf32>
    %93 = tpu.matmul %92, %37, %cst_45 {dimension_numbers = #tpu.dot_dimension_numbers<[1], [0], [0], [1], [0, 0, 1, 1], [], []>} : vector<2x16xbf16>, vector<16x32xbf16>, vector<2x32xf32> -> vector<2x32xf32>
    %94 = vector.broadcast %38 : vector<1x32xf32> to vector<2x32xf32>
    %95 = arith.addf %93, %94 : vector<2x32xf32>
    %cst_46 = arith.constant 5.000000e-01 : f32
    %96 = vector.broadcast %cst_46 : f32 to vector<2x32xf32>
    %97 = arith.mulf %96, %95 : vector<2x32xf32>
    %cst_47 = arith.constant 0.707106769 : f32
    %98 = vector.broadcast %cst_47 : f32 to vector<2x32xf32>
    %99 = arith.mulf %95, %98 : vector<2x32xf32>
    %cst_48 = arith.constant 0.000000e+00 : f32
    %100 = vector.broadcast %cst_48 : f32 to vector<2x32xf32>
    %101 = arith.cmpf oge, %99, %100 : vector<2x32xf32>
    %cst_49 = arith.constant 1.000000e+00 : f32
    %cst_50 = arith.constant -1.000000e+00 : f32
    %102 = vector.broadcast %cst_49 : f32 to vector<2x32xf32>
    %103 = vector.broadcast %cst_50 : f32 to vector<2x32xf32>
    %104 = arith.select %101, %102, %103 : vector<2x32xi1>, vector<2x32xf32>
    %105 = math.absf %99 : vector<2x32xf32>
    %cst_51 = arith.constant 0.327591091 : f32
    %106 = vector.broadcast %cst_51 : f32 to vector<2x32xf32>
    %107 = arith.mulf %106, %105 : vector<2x32xf32>
    %cst_52 = arith.constant 1.000000e+00 : f32
    %108 = vector.broadcast %cst_52 : f32 to vector<2x32xf32>
    %109 = arith.addf %108, %107 : vector<2x32xf32>
    %cst_53 = arith.constant 1.000000e+00 : f32
    %110 = vector.broadcast %cst_53 : f32 to vector<2x32xf32>
    %111 = arith.divf %110, %109 : vector<2x32xf32>
    %cst_54 = arith.constant 1.06140542 : f32
    %112 = vector.broadcast %cst_54 : f32 to vector<2x32xf32>
    %113 = arith.mulf %112, %111 : vector<2x32xf32>
    %cst_55 = arith.constant -1.45315206 : f32
    %114 = vector.broadcast %cst_55 : f32 to vector<2x32xf32>
    %115 = arith.addf %113, %114 : vector<2x32xf32>
    %116 = arith.mulf %115, %111 : vector<2x32xf32>
    %cst_56 = arith.constant 1.42141378 : f32
    %117 = vector.broadcast %cst_56 : f32 to vector<2x32xf32>
    %118 = arith.addf %116, %117 : vector<2x32xf32>
    %119 = arith.mulf %118, %111 : vector<2x32xf32>
    %cst_57 = arith.constant -0.284496725 : f32
    %120 = vector.broadcast %cst_57 : f32 to vector<2x32xf32>
    %121 = arith.addf %119, %120 : vector<2x32xf32>
    %122 = arith.mulf %121, %111 : vector<2x32xf32>
    %cst_58 = arith.constant 0.254829586 : f32
    %123 = vector.broadcast %cst_58 : f32 to vector<2x32xf32>
    %124 = arith.addf %122, %123 : vector<2x32xf32>
    %125 = arith.mulf %124, %111 : vector<2x32xf32>
    %cst_59 = arith.constant 0.000000e+00 : f32
    %126 = vector.broadcast %cst_59 : f32 to vector<2x32xf32>
    %127 = arith.subf %126, %105 : vector<2x32xf32>
    %128 = arith.mulf %127, %105 : vector<2x32xf32>
    %129 = math.exp %128 : vector<2x32xf32>
    %130 = arith.mulf %125, %129 : vector<2x32xf32>
    %cst_60 = arith.constant 1.000000e+00 : f32
    %131 = vector.broadcast %cst_60 : f32 to vector<2x32xf32>
    %132 = arith.subf %131, %130 : vector<2x32xf32>
    %133 = arith.mulf %104, %132 : vector<2x32xf32>
    %cst_61 = arith.constant 1.000000e+00 : f32
    %134 = vector.broadcast %cst_61 : f32 to vector<2x32xf32>
    %135 = arith.addf %134, %133 : vector<2x32xf32>
    %136 = arith.mulf %97, %135 : vector<2x32xf32>
    %137 = vector.broadcast %39 : vector<1x32xf32> to vector<2x32xf32>
    %138 = arith.mulf %136, %137 : vector<2x32xf32>
    %139 = vector.extract_strided_slice %138 {offsets = [0, 0], sizes = [2, 16], strides = [1, 1]} : vector<2x32xf32> to vector<2x16xf32>
    %140 = vector.extract_strided_slice %138 {offsets = [0, 16], sizes = [2, 16], strides = [1, 1]} : vector<2x32xf32> to vector<2x16xf32>
    %141 = arith.addf %139, %140 : vector<2x16xf32>
    %142 = tpu.concatenate %90, %141 in 1 : vector<2x16xf32>, vector<2x16xf32> -> vector<2x32xf32>
    %c0_62 = arith.constant 0 : index
    %c0_63 = arith.constant 0 : index
    %143 = vector.load %arg11[%c0_62, %c0_63] : memref<1x1xf32, #tpu.memory_space<vmem>>, vector<1x1xf32>
    %144 = vector.broadcast %143 : vector<1x1xf32> to vector<2x32xf32>
    %145 = arith.addf %142, %144 : vector<2x32xf32>
    %cst_64 = arith.constant 0.000000e+00 : f32
    %146 = vector.broadcast %cst_64 : f32 to vector<2x32xf32>
    %147 = arith.subf %146, %145 : vector<2x32xf32>
    %148 = math.exp %147 : vector<2x32xf32>
    %cst_65 = arith.constant 1.000000e+00 : f32
    %149 = vector.broadcast %cst_65 : f32 to vector<2x32xf32>
    %150 = arith.addf %149, %148 : vector<2x32xf32>
    %cst_66 = arith.constant 1.000000e+00 : f32
    %151 = vector.broadcast %cst_66 : f32 to vector<2x32xf32>
    %152 = arith.divf %151, %150 : vector<2x32xf32>
    %153 = arith.mulf %36, %152 : vector<2x32xf32>
    %cst_67 = arith.constant dense<0.000000e+00> : vector<16xf32>
    %154 = vector.multi_reduction <add>, %6, %cst_67 [1] : vector<16x32xf32> to vector<16xf32>
    %155 = vector.shape_cast %154 : vector<16xf32> to vector<16x1xf32>
    %cst_68 = arith.constant 3.200000e+01 : f32
    %156 = vector.broadcast %cst_68 : f32 to vector<16x1xf32>
    %157 = arith.divf %155, %156 : vector<16x1xf32>
    %158 = vector.broadcast %157 : vector<16x1xf32> to vector<16x32xf32>
    %159 = arith.subf %6, %158 : vector<16x32xf32>
    %160 = arith.mulf %159, %159 : vector<16x32xf32>
    %cst_69 = arith.constant dense<0.000000e+00> : vector<16xf32>
    %161 = vector.multi_reduction <add>, %160, %cst_69 [1] : vector<16x32xf32> to vector<16xf32>
    %162 = vector.shape_cast %161 : vector<16xf32> to vector<16x1xf32>
    %cst_70 = arith.constant 3.200000e+01 : f32
    %163 = vector.broadcast %cst_70 : f32 to vector<16x1xf32>
    %164 = arith.divf %162, %163 : vector<16x1xf32>
    %165 = vector.broadcast %157 : vector<16x1xf32> to vector<16x32xf32>
    %166 = arith.subf %6, %165 : vector<16x32xf32>
    %cst_71 = arith.constant 9.99999974E-6 : f32
    %167 = vector.broadcast %cst_71 : f32 to vector<16x1xf32>
    %168 = arith.addf %164, %167 : vector<16x1xf32>
    %169 = math.rsqrt %168 : vector<16x1xf32>
    %170 = vector.broadcast %169 : vector<16x1xf32> to vector<16x32xf32>
    %171 = arith.mulf %166, %170 : vector<16x32xf32>
    %c0_72 = arith.constant 0 : index
    %c0_73 = arith.constant 0 : index
    %172 = vector.load %arg14[%c0_72, %c0_73] : memref<1x32xf32, #tpu.memory_space<vmem>>, vector<1x32xf32>
    %173 = vector.broadcast %172 : vector<1x32xf32> to vector<16x32xf32>
    %174 = arith.mulf %171, %173 : vector<16x32xf32>
    %c0_74 = arith.constant 0 : index
    %c0_75 = arith.constant 0 : index
    %175 = vector.load %arg15[%c0_74, %c0_75] : memref<1x32xf32, #tpu.memory_space<vmem>>, vector<1x32xf32>
    %176 = vector.broadcast %175 : vector<1x32xf32> to vector<16x32xf32>
    %177 = arith.addf %174, %176 : vector<16x32xf32>
    %178 = vector.shape_cast %153 : vector<2x32xf32> to vector<2x1x32xf32>
    %179 = vector.broadcast %178 : vector<2x1x32xf32> to vector<2x8x32xf32>
    %180 = arith.mulf %7, %179 : vector<2x8x32xf32>
    %181 = vector.shape_cast %180 : vector<2x8x32xf32> to vector<16x32xf32>
    %182 = arith.truncf %181 : vector<16x32xf32> to vector<16x32xbf16>
    %c0_76 = arith.constant 0 : index
    %c0_77 = arith.constant 0 : index
    %183 = vector.load %arg12[%c0_76, %c0_77] : memref<32x32xbf16, #tpu.memory_space<vmem>>, vector<32x32xbf16>
    %cst_78 = arith.constant dense<0.000000e+00> : vector<16x32xf32>
    %184 = tpu.matmul %182, %183, %cst_78 {dimension_numbers = #tpu.dot_dimension_numbers<[1], [0], [0], [1], [0, 0, 1, 1], [], []>} : vector<16x32xbf16>, vector<32x32xbf16>, vector<16x32xf32> -> vector<16x32xf32>
    %c0_79 = arith.constant 0 : index
    %c0_80 = arith.constant 0 : index
    %185 = vector.load %arg13[%c0_79, %c0_80] : memref<1x32xf32, #tpu.memory_space<vmem>>, vector<1x32xf32>
    %186 = vector.broadcast %185 : vector<1x32xf32> to vector<16x32xf32>
    %187 = arith.addf %184, %186 : vector<16x32xf32>
    %188 = arith.addf %187, %177 : vector<16x32xf32>
    %189 = vector.shape_cast %188 : vector<16x32xf32> to vector<2x8x32xf32>
    %c0_81 = arith.constant 0 : index
    %c0_82 = arith.constant 0 : index
    %c0_83 = arith.constant 0 : index
    %190 = vector.load %arg16[%c0_81, %c0_82, %c0_83] : memref<2x8x32xf32, #tpu.memory_space<vmem>>, vector<2x8x32xf32>
    tpu.vector_store %arg16[%c0_81, %c0_82, %c0_83], %189 {strides = array<i32>} : memref<2x8x32xf32, #tpu.memory_space<vmem>>, vector<2x8x32xf32>,
    return
  }
  func.func @transform_0(%arg0: i32) -> (i32, i32, i32) {
    %c0_i32 = arith.constant 0 : i32
    %c0_i32_0 = arith.constant 0 : i32
    %c0_i32_1 = arith.constant 0 : i32
    return %arg0, %c0_i32, %c0_i32_0 : i32, i32, i32
  }
  func.func @transform_1(%arg0: i32) -> (i32, i32) {
    %c0_i32 = arith.constant 0 : i32
    %c0_i32_0 = arith.constant 0 : i32
    %c0_i32_1 = arith.constant 0 : i32
    return %c0_i32, %c0_i32_0 : i32, i32
  }
  func.func @transform_2(%arg0: i32) -> (i32, i32) {
    %c0_i32 = arith.constant 0 : i32
    %c0_i32_0 = arith.constant 0 : i32
    %c0_i32_1 = arith.constant 0 : i32
    return %c0_i32, %c0_i32_0 : i32, i32
  }
  func.func @transform_3(%arg0: i32) -> (i32, i32) {
    %c0_i32 = arith.constant 0 : i32
    %c0_i32_0 = arith.constant 0 : i32
    %c0_i32_1 = arith.constant 0 : i32
    return %c0_i32, %c0_i32_0 : i32, i32
  }
  func.func @transform_4(%arg0: i32) -> (i32, i32) {
    %c0_i32 = arith.constant 0 : i32
    %c0_i32_0 = arith.constant 0 : i32
    %c0_i32_1 = arith.constant 0 : i32
    return %c0_i32, %c0_i32_0 : i32, i32
  }
  func.func @transform_5(%arg0: i32) -> (i32, i32) {
    %c0_i32 = arith.constant 0 : i32
    %c0_i32_0 = arith.constant 0 : i32
    %c0_i32_1 = arith.constant 0 : i32
    return %c0_i32, %c0_i32_0 : i32, i32
  }
  func.func @transform_6(%arg0: i32) -> (i32, i32) {
    %c0_i32 = arith.constant 0 : i32
    %c0_i32_0 = arith.constant 0 : i32
    %c0_i32_1 = arith.constant 0 : i32
    return %c0_i32, %c0_i32_0 : i32, i32
  }
  func.func @transform_7(%arg0: i32) -> (i32, i32) {
    %c0_i32 = arith.constant 0 : i32
    %c0_i32_0 = arith.constant 0 : i32
    %c0_i32_1 = arith.constant 0 : i32
    return %c0_i32, %c0_i32_0 : i32, i32
  }
  func.func @transform_8(%arg0: i32) -> (i32, i32) {
    %c0_i32 = arith.constant 0 : i32
    %c0_i32_0 = arith.constant 0 : i32
    %c0_i32_1 = arith.constant 0 : i32
    return %c0_i32, %c0_i32_0 : i32, i32
  }
  func.func @transform_9(%arg0: i32) -> (i32, i32) {
    %c0_i32 = arith.constant 0 : i32
    %c0_i32_0 = arith.constant 0 : i32
    %c0_i32_1 = arith.constant 0 : i32
    return %c0_i32, %c0_i32_0 : i32, i32
  }
  func.func @transform_10(%arg0: i32) -> (i32, i32) {
    %c0_i32 = arith.constant 0 : i32
    %c0_i32_0 = arith.constant 0 : i32
    %c0_i32_1 = arith.constant 0 : i32
    return %c0_i32, %c0_i32_0 : i32, i32
  }
  func.func @transform_11(%arg0: i32) -> (i32, i32) {
    %c0_i32 = arith.constant 0 : i32
    %c0_i32_0 = arith.constant 0 : i32
    %c0_i32_1 = arith.constant 0 : i32
    return %c0_i32, %c0_i32_0 : i32, i32
  }
  func.func @transform_12(%arg0: i32) -> (i32, i32) {
    %c0_i32 = arith.constant 0 : i32
    %c0_i32_0 = arith.constant 0 : i32
    %c0_i32_1 = arith.constant 0 : i32
    return %c0_i32, %c0_i32_0 : i32, i32
  }
  func.func @transform_13(%arg0: i32) -> (i32, i32) {
    %c0_i32 = arith.constant 0 : i32
    %c0_i32_0 = arith.constant 0 : i32
    %c0_i32_1 = arith.constant 0 : i32
    return %c0_i32, %c0_i32_0 : i32, i32
  }
  func.func @transform_14(%arg0: i32) -> (i32, i32) {
    %c0_i32 = arith.constant 0 : i32
    %c0_i32_0 = arith.constant 0 : i32
    %c0_i32_1 = arith.constant 0 : i32
    return %c0_i32, %c0_i32_0 : i32, i32
  }
  func.func @transform_15(%arg0: i32) -> (i32, i32, i32) {
    %c0_i32 = arith.constant 0 : i32
    %c0_i32_0 = arith.constant 0 : i32
    %c0_i32_1 = arith.constant 0 : i32
    return %arg0, %c0_i32, %c0_i32_0 : i32, i32, i32
  }
}

</mosaic_0001>

<bundles_post_ra>
// kernel: tpu_custom_call.1
= control target key start
LH: loop header
LB: loop body
LE: loop exit
PB: predicated region body
PF: predicated region fallthrough
CT: control target
= control target key end

     0   :  { %s1287_s0 = inlined_call_operand.hbm [shape: bf16[2,8,32], index: 0, kind: input, shape index: {}]   ;;  %s1288_s1 = inlined_call_operand.hbm [shape: f32[32,32], index: 1, kind: input, shape index: {}]   ;;  %s1289_s2 = inlined_call_operand.vmem [shape: f32[1,32], index: 2, kind: input, shape index: {}]   ;;  %s1290_s3 = inlined_call_operand.vmem [shape: f32[1,32], index: 3, kind: input, shape index: {}]   ;;  %s1291_s4 = inlined_call_operand.vmem [shape: f32[8,1], index: 4, kind: input, shape index: {}]   ;;  %s1292_s5 = inlined_call_operand.vmem [shape: bf16[32,32], index: 5, kind: input, shape index: {}]   ;;  %s1293_s6 = inlined_call_operand.vmem [shape: f32[1,32], index: 6, kind: input, shape index: {}]   ;;  %s1294_s7 = inlined_call_operand.hbm [shape: bf16[16,32], index: 7, kind: input, shape index: {}]   ;;  %s1295_s8 = inlined_call_operand.vmem [shape: f32[1,32], index: 8, kind: input, shape index: {}]   ;;  %s1296_s9 = inlined_call_operand.vmem [shape: f32[1,32], index: 9, kind: input, shape index: {}]   ;;  %s1297_s10 = inlined_call_operand.<no memory space> [shape: f32[1,1], index: 10, kind: input, shape index: {}]   ;;  %s1298_s11 = inlined_call_operand.vmem [shape: bf16[32,32], index: 11, kind: input, shape index: {}]   ;;  %s1299_s12 = inlined_call_operand.vmem [shape: f32[1,32], index: 12, kind: input, shape index: {}]   ;;  %s1300_s13 = inlined_call_operand.vmem [shape: f32[1,32], index: 13, kind: input, shape index: {}]   ;;  %s1301_s14 = inlined_call_operand.vmem [shape: f32[1,32], index: 14, kind: input, shape index: {}]   ;;  %s1302_s15 = inlined_call_operand.hbm [shape: f32[2,8,32], index: 15, kind: output, shape index: {}]  }
   0x1   :  { %v20_v0 = vstv %s1297_s10 }
   0x2   :  { %21 = vst [vmem:[#allocation2] sm:$0x1] %v20_v0 }
   0x3   :  { %22 = vsyncpa [#allocation4], 0 }
   0x4   :  { %23 = vsyncpa [#allocation7], 0 }
   0x5   :  { %24 = vsyncpa [#allocation5], 0  ;;  %s1022_s20 = smov [#allocation6]   ;;  %s928_s24 = scalar_lea.hbm %s1288_s1, 512 }
   0x6   :  { %s42_s21 = sshll.u32 %s1022_s20, 4  ;;  %p929_p0 = scmp.ne.s32.totalorder %s1288_s1, %s928_s24  ;;  %s43_s21 = int_to_ptr.vmem [resolvable:$true] %s42_s21 }
   0x7   :  { %p932_p1 = scmp.lt.u32.totalorder %s928_s24, %s1288_s1 }
   0x9   :  { %p934_p2 = pnand %p932_p1, %p929_p0 }
   0xb   :  { %937 = shalt.err (!%p934_p2)
}
   0xc   :  { %s938_s10 = scalar_lea.vmem %s43_s21, 512  ;;  %p943_p4 = scmp.lt.s32.totalorder %s43_s21, %s43_s21 }
   0xd   :  { %p939_p3 = scmp.ne.s32.totalorder %s43_s21, %s938_s10  ;;  %p944_p5 = scmp.lt.s32.totalorder %s938_s10, %s938_s10 }
   0xf   :  { %p945_p6 = por %p944_p5, %p943_p4 }
  0x11   :  { %p946_p7 = pnand %p945_p6, %p939_p3 }
  0x13   :  { %949 = shalt.err (!%p946_p7)
}
  0x14   :  { %s1023_s29 = smov 128   ;;  %s1024_s30 = smov 8  }
  0x15   :  { %48 = dma.hbm_to_vmem [thread:$0]  %s1288_s1, 512, %s43_s21, [#allocation7], %s1023_s29, %s1023_s29, %s1024_s30  }
  0x16   :  { %s1025_s18 = smov [#allocation3]   ;;  %s950_s23 = scalar_lea.hbm %s1287_s0, 128 }
  0x17   :  { %s30_s19 = sshll.u32 %s1025_s18, 4  ;;  %p951_p8 = scmp.ne.s32.totalorder %s1287_s0, %s950_s23  ;;  %s31_s19 = int_to_ptr.vmem [resolvable:$true] %s30_s19 }
  0x18   :  { %p954_p9 = scmp.lt.u32.totalorder %s950_s23, %s1287_s0 }
  0x1a   :  { %p956_p10 = pnand %p954_p9, %p951_p8 }
  0x1c   :  { %959 = shalt.err (!%p956_p10)
}
  0x1d   :  { %s960_s28 = scalar_lea.vmem %s31_s19, 128  ;;  %p965_p12 = scmp.lt.s32.totalorder %s31_s19, %s31_s19 }
  0x1e   :  { %p961_p11 = scmp.ne.s32.totalorder %s31_s19, %s960_s28  ;;  %p966_p13 = scmp.lt.s32.totalorder %s960_s28, %s960_s28 }
  0x20   :  { %p967_p0 = por %p966_p13, %p965_p12 }
  0x22   :  { %p968_p1 = pnand %p967_p0, %p961_p11 }
  0x24   :  { %971 = shalt.err (!%p968_p1)
}
  0x25   :  { %s1026_s1 = smov 64   ;;  %s1027_s21 = smov 4  }
  0x26   :  { %36 = dma.hbm_to_vmem [thread:$0]  %s1287_s0, 128, %s31_s19, [#allocation4], %s1026_s1, %s1026_s1, %s1027_s21  }
  0x27   :  { %s1028_s17 = smov [#allocation8]   ;;  %s972_s23 = scalar_lea.hbm %s1294_s7, 128 }
  0x28   :  { %s64_s18 = sshll.u32 %s1028_s17, 4  ;;  %p973_p2 = scmp.ne.s32.totalorder %s1294_s7, %s972_s23  ;;  %s65_s18 = int_to_ptr.vmem [resolvable:$true] %s64_s18 }
  0x29   :  { %p976_p3 = scmp.lt.u32.totalorder %s972_s23, %s1294_s7 }
  0x2b   :  { %p978_p4 = pnand %p976_p3, %p973_p2 }
  0x2d   :  { %981 = shalt.err (!%p978_p4)
}
  0x2e   :  { %s982_s28 = scalar_lea.vmem %s65_s18, 128  ;;  %p987_p6 = scmp.lt.s32.totalorder %s65_s18, %s65_s18 }
  0x2f   :  { %p983_p5 = scmp.ne.s32.totalorder %s65_s18, %s982_s28  ;;  %p988_p7 = scmp.lt.s32.totalorder %s982_s28, %s982_s28 }
  0x31   :  { %p989_p8 = por %p988_p7, %p987_p6 }
  0x33   :  { %p990_p9 = pnand %p989_p8, %p983_p5 }
  0x35   :  { %993 = shalt.err (!%p990_p9)
}
  0x36   :  { %70 = dma.hbm_to_vmem [thread:$0]  %s1294_s7, 128, %s65_s18, [#allocation7], %s1026_s1, %s1026_s1, %s1027_s21  }
  0x37   :  { %1016 = dma.done.wait [#allocation4], 128  }
  0x38   :  { %1017 = vsyncadd [#allocation4], 4294967168 }
  0x39   :  { %1018 = dma.done.wait [#allocation7], 640  }
  0x3a   :  { %1019 = vsyncadd [#allocation7], 4294966656  ;;  %v1029_v1 = vmov 0.0   ;;  %vm1030_vm0 = vmmov 0   ;;  %v1031_v2 = vmov 0   ;;  %v1032_v3 = vmov 0.0|0.0  }
  0x3b   :  { %822 = vmatprep.subr.bf16.mxu0 %v1029_v1  ;;  %826 = vmatprep.mubr.msk.bf16.mxu0 %vm1030_vm0, %v1029_v1  ;;  %v901_v4 = vld [vmem:[%s1292_s5] sm:$0xff]   ;;  %v902_v5 = vld [vmem:[%s1292_s5 + $0x8] sm:$0xff]   ;;  %vm125_vm1 = vcmask 261120   ;;  %v212_v8 = vld [vmem:[#allocation6 + $0x8] sm:$0xff]  ;;  %vm224_vm2 = vcmask 1041409   ;;  %vm428_vm3 = vcmask 130048  }
  0x3c   :  { %900 = vset.pattern.permute.xlu0 %v1031_v2  ;;  %872 = vmatprep.subr.bf16.mxu1 %v1032_v3  ;;  %v95_v6 = vld [vmem:[#allocation3] sm:$0xff]   ;;  %v211_v7 = vld [vmem:[#allocation6] sm:$0xff]  ;;  %v213_v12 = vld [vmem:[#allocation6 + $0x10] sm:$0xff]  ;;  %s1033_s22 = smov 112   ;;  %vm380_vm4 = vcmask 254976   ;;  %s1037_s21 = smov [#allocation9]  }
  0x3d   :  { %838 = vmatprep.mubr.msk.f32.mxu1 %vm1030_vm0, %v1029_v1  ;;  %823 = vmatpush3.bf16.msra.mxu0 %v901_v4  ;;  %v170_v9 = vunpack.c.l.bf16 %v95_v6  ;;  %v171_v10 = vunpack.c.h.bf16 %v95_v6  ;;  %v873_v11 = vpack.c.bf16 %v212_v8, %v211_v7  ;;  %v214_v13 = vld [vmem:[#allocation6 + $0x18] sm:$0xff]  ;;  %v904_v33 = vld [vmem:[#allocation8] sm:$0xff]   ;;  %v1198_v54 = vld [vmem:[%s1293_s6] ss:$0 sm:$0xff]  ;;  %s768_s16 = sshll.u32 %s1037_s21, 4  ;;  %s769_s16 = int_to_ptr.vmem [resolvable:$true] %s768_s16 }
  0x3e   :  { %824 = vmatprep.subr.bf16.mxu0 %v1029_v1  ;;  %v172_v14 = vld [vmem:[%s1291_s4] sm:$0xff]  ;;  %v876_v19 = vpack.c.bf16 %v214_v13, %v213_v12  ;;  %p999_p11 = scmp.lt.s32.totalorder %s769_s16, %s769_s16 }
  0x3f   :  { %175 = vperm.xlu0 %900, %v172_v14   ;;  %v194_v15 = vsel %vm125_vm1, %v170_v9, 0.0  ;;  %v201_v16 = vsel %vm125_vm1, %v171_v10, 0.0  ;;  %874 = vmatpush3.bf16.msra.mxu1 %v873_v11  ;;  %v788_v58 = vld [vmem:[%s1290_s3] ss:$0 sm:$0xff] }
  0x40   :  { %v195_v17 = vrot.slane %v194_v15, 4  ;;  %v202_v18 = vrot.slane %v201_v16, 4  ;;  %875 = vmatprep.subr.bf16.mxu1 %v1032_v3  ;;  %v795_v63 = vld [vmem:[#allocation2] ss:$0 sm:$0xff] }
  0x41   :  { %825 = vmatpush3.bf16.msra.mxu0 %v902_v5  ;;  %v786_v2 = vld [vmem:[%s1289_s2] ss:$0 sm:$0xff] }
  0x42   :  { %878 = vmatprep.subr.bf16.mxu0 %v1032_v3  ;;  %v196_v20 = vadd.f32 %v195_v17, %v194_v15  ;;  %v203_v21 = vadd.f32 %v202_v18, %v201_v16  ;;  %v790_v7 = vld [vmem:[%s1295_s8] ss:$0 sm:$0xff] }
  0x43   :  { %877 = vmatpush3.bf16.msra.mxu1 %v876_v19 }
  0x44   :  { %827 = vmatmul.mubr.msk.bf16.vlgmr.msra.gmra.mrb[0].mxu0 %vm125_vm1, %v95_v6  ;;  %v197_v22 = vrot.slane %v196_v20, 2  ;;  %v204_v23 = vrot.slane %v203_v21, 2  ;;  %852 = vmatprep.subr.bf16.mxu1 %v1029_v1 }
  0x45   :  { %880 = vmatpush3.bf16.msra.mxu0 %v873_v11  ;;  %849 = vmatprep.mubr.msk.f32.mxu0 %vm1030_vm0, %v1029_v1 }
  0x46   :  { %881 = vmatprep.subr.bf16.mxu0 %v1032_v3  ;;  %v198_v24 = vadd.f32 %v197_v22, %v196_v20  ;;  %v205_v25 = vadd.f32 %v204_v23, %v203_v21 }
  0x48   :  { %v199_v26 = vrot.slane %v198_v24, 1  ;;  %v206_v27 = vrot.slane %v205_v25, 1 }
  0x49   :  { %883 = vmatpush3.bf16.msra.mxu0 %v876_v19 }
  0x4a   :  { %858 = vmatprep.subr.bf16.mxu0 %v1029_v1  ;;  %v200_v28 = vadd.f32 %v199_v26, %v198_v24  ;;  %v207_v29 = vadd.f32 %v206_v27, %v205_v25 }
  0x4c   :  { %v209_v30 = vmul.f32 0.125, %v200_v28  ;;  %v210_v31 = vmul.f32 0.125, %v207_v29 }
  0x4e   :  { %v307_v32 = vsel %vm224_vm2, %v210_v31, %v209_v30 }
  0x4f   :  { %850 = vmatmul.mubr.msk.f32.vlgmr.msra.gmra.mrb[4].mxu0 %vm125_vm1, %v307_v32 }
  0x50   :  { %860 = vmatprep.mubr.msk.bf16.mxu0 %vm1030_vm0, %v1029_v1  ;;  %859 = vmatpush3.bf16.msra.mxu0 %v904_v33 }
  0xbe   :  { %v176_v34 = vpop.permute.xlu0 %175 }
  0xbf   :  { %v178_v35 = vmul.f32 %v176_v34, %v170_v9  ;;  %v179_v36 = vmul.f32 %v176_v34, %v171_v10 }
  0xc1   :  { %v180_v37 = vsel %vm125_vm1, %v178_v35, 0.0  ;;  %v187_v38 = vsel %vm125_vm1, %v179_v36, 0.0 }
  0xc2   :  { %v181_v39 = vrot.slane %v180_v37, 4  ;;  %v188_v40 = vrot.slane %v187_v38, 4 }
  0xc4   :  { %v182_v41 = vadd.f32 %v181_v39, %v180_v37  ;;  %v189_v42 = vadd.f32 %v188_v40, %v187_v38  ;;  %v793_v38 = vld [vmem:[%s1296_s9] ss:$0 sm:$0xff]  ;;  %s1035_s9 = smov 16  }
  0xc6   :  { %v183_v43 = vrot.slane %v182_v41, 2  ;;  %v190_v44 = vrot.slane %v189_v42, 2 }
  0xc8   :  { %v184_v45 = vadd.f32 %v183_v43, %v182_v41  ;;  %v191_v46 = vadd.f32 %v190_v44, %v189_v42 }
  0xca   :  { %v185_v47 = vrot.slane %v184_v45, 1  ;;  %v192_v48 = vrot.slane %v191_v46, 1 }
  0xcc   :  { %v186_v49 = vadd.f32 %v185_v47, %v184_v45  ;;  %v193_v50 = vadd.f32 %v192_v48, %v191_v46 }
  0xce   :  { %v225_v51 = vsel %vm224_vm2, %v193_v50, %v186_v49 }
  0xcf   :  { %839 = vmatmul.mubr.msk.f32.vlgmr.msra.gmra.mrb[0].mxu1 %vm125_vm1, %v225_v51 }
  0xd0   :  { %853 = vmatpush3.bf16.msra.mxu1 %v904_v33  ;;  %854 = vmatprep.mubr.msk.bf16.mxu1 %vm1030_vm0, %v1029_v1  ;;  %v1034_v33 = vmov -1.0  }
  0xd1   :  { %864 = vmatprep.subr.bf16.mxu1 %v1029_v1 }
 0x117   :  { %v1193_v52 = vpop.f32.mrb[0].mxu0 }
 0x118   :  { %v828_v53 = vpop.f32.mrb[1].mxu0 }
 0x119   :  { %v166_v55 = vpop.f32.mrb[2].mxu0 }
 0x11a   :  { %v1201_v56 = vadd.f32 %v1198_v54, %v166_v55  ;;  %v829_v57 = vpop.f32.mrb[3].mxu0 }
 0x122   :  { %v376_v59 = vpop.f32.mrb[4].mxu0 }
 0x123   :  { %v377_v60 = vadd.f32 %v788_v58, %v376_v59  ;;  %v851_v61 = vpop.f32.mrb[5].mxu0 }
 0x125   :  { %v415_v62 = vpack.c.bf16 %v377_v60, %v377_v60 }
 0x127   :  { %512 = vrot.lane.b32.xlu0 %v415_v62, %s1033_s22  ;;  %855 = vmatmul.mubr.msk.bf16.vlgmr.msra.gmra.mrb[4].mxu1 %vm428_vm3, %v415_v62 }
 0x128   :  { %868 = vmatprep.mubr.msk.bf16.mxu1 %vm1030_vm0, %v1029_v1 }
 0x12b   :  { %602 = vperm.xlu0 %900, %v795_v63  }
 0x199   :  { %v513_v0 = vpop.permute.xlu0 %512 }
 0x19a   :  { %861 = vmatmul.mubr.msk.bf16.vlgmr.msra.gmra.mrb[8].mxu0 %vm428_vm3, %v513_v0 }
 0x1a2   :  { %v294_v3 = vpop.f32.mrb[0].mxu1 }
 0x1a3   :  { %v1214_v4 = vadd.f32 %v786_v2, %v294_v3  ;;  %v840_v5 = vpop.f32.mrb[1].mxu1 }
 0x1a5   :  { %v381_v6 = vsel %vm380_vm4, %v1214_v4, -inf }
 0x1a6   :  { %382 = vmax.xlane.f32.xlu1 %v381_v6 }
 0x1fa   :  { %v466_v8 = vpop.f32.mrb[4].mxu1 }
 0x1fb   :  { %v467_v9 = vadd.f32 %v790_v7, %v466_v8  ;;  %v856_v10 = vpop.f32.mrb[5].mxu1 }
 0x1fc   :  { %v469_v11 = vpop.f32.mrb[6].mxu1 }
 0x1fd   :  { %v473_v12 = vmul.f32 0.70710677, %v467_v9  ;;  %v857_v13 = vpop.f32.mrb[7].mxu1  ;;  %v472_v36 = vmul.f32 0.5, %v467_v9 }
 0x1fe   :  { %v1231_v13 = vadd.f32 %v1198_v54, %v1193_v52  ;;  %v399_v52 = vsel %vm125_vm1, %v1201_v56, 0.0 }
 0x1ff   :  { %v476_v14 = vand.u32 2147483647, %v473_v12  ;;  %vm474_vm5 = vcmp.ge.f32.partialorder %v473_v12, 0.0 }
 0x200   :  { %v475_v34 = vsel %vm474_vm5, 1.0, %v1034_v33 }
 0x201   :  { %v477_v15 = vmul.f32 0.3275911, %v476_v14  ;;  %v490_v17 = vsub.f32 0.0, %v476_v14 }
 0x203   :  { %v478_v16 = vadd.f32 1.0, %v477_v15  ;;  %v491_v19 = vmul.f32 %v490_v17, %v476_v14  ;;  %v392_v14 = vsel %vm125_vm1, %v1231_v13, 0.0 }
 0x205   :  { %908 = vrcp.f32 %v478_v16  ;;  %v492_v22 = vmul.f32 1.442695, %v491_v19 }
 0x207   :  { %910 = vpow2.f32 %v492_v22 }
 0x20f   :  { %v909_v18 = vpop.eup %908 }
 0x210   :  { %v481_v20 = vmul.f32 1.0614054, %v909_v18 }
 0x211   :  { %v911_v30 = vpop.eup %910 }
 0x212   :  { %v482_v21 = vadd.f32 -1.4531521, %v481_v20 }
 0x214   :  { %v483_v23 = vmul.f32 %v909_v18, %v482_v21 }
 0x216   :  { %v484_v24 = vadd.f32 1.4214138, %v483_v23 }
 0x218   :  { %v485_v25 = vmul.f32 %v909_v18, %v484_v24  ;;  %v905_v24 = vld [vmem:[%s1298_s11] sm:$0xff]  }
 0x219   :  { %865 = vmatpush3.bf16.msra.mxu1 %v905_v24 }
 0x21a   :  { %v486_v26 = vadd.f32 -0.28449672, %v485_v25  ;;  %v906_v25 = vld [vmem:[%s1298_s11 + $0x8] sm:$0xff]   ;;  %866 = vmatprep.subr.bf16.mxu1 %v1029_v1 }
 0x21c   :  { %v487_v27 = vmul.f32 %v909_v18, %v486_v26 }
 0x21d   :  { %867 = vmatpush3.bf16.msra.mxu1 %v906_v25 }
 0x21e   :  { %v488_v28 = vadd.f32 0.2548296, %v487_v27  ;;  %v603_v27 = vpop.permute.xlu0 %602 }
 0x220   :  { %v489_v29 = vmul.f32 %v909_v18, %v488_v28 }
 0x222   :  { %v494_v31 = vmul.f32 %v911_v30, %v489_v29 }
 0x224   :  { %v495_v32 = vsub.f32 1.0, %v494_v31 }
 0x226   :  { %v496_v35 = vmul.f32 %v495_v32, %v475_v34 }
 0x228   :  { %v497_v37 = vadd.f32 1.0, %v496_v35  ;;  %v400_v35 = vrot.slane %v399_v52, 4 }
 0x22a   :  { %v498_v39 = vmul.f32 %v497_v37, %v472_v36  ;;  %v393_v36 = vrot.slane %v392_v14, 4  ;;  %v401_v37 = vadd.f32 %v400_v35, %v399_v52 }
 0x22c   :  { %v1224_v40 = vmul.f32 %v793_v38, %v498_v39  ;;  %v402_v39 = vrot.slane %v401_v37, 2 }
 0x22e   :  { %507 = vrot.lane.b32.xlu0 %v1224_v40, %s1033_s22 }
 0x233   :  { %v383_v15 = vpop.xlane.xlu1 %382 }
 0x234   :  { %v384_v18 = vsub.f32 %v1214_v4, %v383_v15 }
 0x236   :  { %v385_v19 = vmul.f32 1.442695, %v384_v18 }
 0x26d   :  { %v551_v41 = vpop.f32.mrb[8].mxu0 }
 0x26e   :  { %v552_v42 = vadd.f32 %v790_v7, %v551_v41  ;;  %v862_v43 = vpop.f32.mrb[9].mxu0 }
 0x26f   :  { %v554_v44 = vpop.f32.mrb[10].mxu0  ;;  %v403_v43 = vadd.f32 %v402_v39, %v401_v37 }
 0x270   :  { %v558_v45 = vmul.f32 0.70710677, %v552_v42  ;;  %v863_v46 = vpop.f32.mrb[11].mxu0  ;;  %v557_v9 = vmul.f32 0.5, %v552_v42 }
 0x272   :  { %v561_v47 = vand.u32 2147483647, %v558_v45  ;;  %vm559_vm6 = vcmp.ge.f32.partialorder %v558_v45, 0.0 }
 0x273   :  { %v560_v7 = vsel %vm559_vm6, 1.0, %v1034_v33 }
 0x274   :  { %v562_v48 = vmul.f32 0.3275911, %v561_v47  ;;  %v575_v50 = vsub.f32 0.0, %v561_v47 }
 0x276   :  { %v563_v49 = vadd.f32 1.0, %v562_v48  ;;  %v576_v53 = vmul.f32 %v575_v50, %v561_v47  ;;  %v1036_v48 = vmov 1966171168   ;;  %v660_v50 = vlaneseq }
 0x278   :  { %912 = vrcp.f32 %v563_v49  ;;  %v577_v58 = vmul.f32 1.442695, %v576_v53  ;;  %v658_v49 = vunpack.c.l.s4 %v1036_v48 }
 0x27a   :  { %914 = vpow2.f32 %v577_v58  ;;  %v659_v58 = vunpack.c.0.s8 %v658_v49 }
 0x27b   :  { %916 = vpow2.f32 %v385_v19 }
 0x282   :  { %v913_v51 = vpop.eup %912 }
 0x283   :  { %v566_v55 = vmul.f32 1.0614054, %v913_v51 }
 0x284   :  { %v915_v3 = vpop.eup %914 }
 0x285   :  { %v567_v57 = vadd.f32 -1.4531521, %v566_v55  ;;  %v917_v20 = vpop.eup %916 }
 0x286   :  { %v387_v21 = vsel %vm380_vm4, %v917_v20, 0.0 }
 0x287   :  { %v568_v59 = vmul.f32 %v913_v51, %v567_v57 }
 0x289   :  { %v569_v60 = vadd.f32 1.4214138, %v568_v59  ;;  %v661_v59 = vshrl.u32 %v660_v50, 7 }
 0x28b   :  { %v570_v61 = vmul.f32 %v913_v51, %v569_v60 }
 0x28d   :  { %v571_v62 = vadd.f32 -0.28449672, %v570_v61 }
 0x28f   :  { %v572_v63 = vmul.f32 %v913_v51, %v571_v62 }
 0x291   :  { %v573_v0 = vadd.f32 0.2548296, %v572_v63 }
 0x293   :  { %v574_v2 = vmul.f32 %v913_v51, %v573_v0 }
 0x295   :  { %v579_v5 = vmul.f32 %v915_v3, %v574_v2  ;;  %v662_v2 = vsub.s32 %v659_v58, %v661_v59 }
 0x297   :  { %v580_v6 = vsub.f32 1.0, %v579_v5 }
 0x299   :  { %v581_v8 = vmul.f32 %v580_v6, %v560_v7 }
 0x29b   :  { %v582_v10 = vadd.f32 1.0, %v581_v8  ;;  %v681_v8 = vsub.s32 0, %v661_v59 }
 0x29d   :  { %v583_v11 = vmul.f32 %v582_v10, %v557_v9 }
 0x29f   :  { %v584_v12 = vmul.f32 %v793_v38, %v583_v11  ;;  %v394_v38 = vadd.f32 %v393_v36, %v392_v14 }
 0x2a0   :  { %v508_v28 = vpop.permute.xlu0 %507 }
 0x2a1   :  { %586 = vrot.lane.b32.xlu1 %v584_v12, %s1033_s22  ;;  %v510_v30 = vadd.f32 %v508_v28, %v1224_v40  ;;  %v395_v1 = vrot.slane %v394_v38, 2  ;;  %v404_v40 = vrot.slane %v403_v43, 1 }
 0x2a3   :  { %v396_v45 = vadd.f32 %v395_v1, %v394_v38  ;;  %v405_v55 = vadd.f32 %v404_v40, %v403_v43 }
 0x2a5   :  { %v397_v51 = vrot.slane %v396_v45, 1 }
 0x2a7   :  { %v398_v61 = vadd.f32 %v397_v51, %v396_v45 }
 0x2a9   :  { %v408_v0 = vsel %vm224_vm2, %v405_v55, %v398_v61 }
 0x2c5   :  { %613 = vadd.xlane.f32.xlu1 %v392_v14 }
 0x313   :  { %v587_v16 = vpop.permute.xlu1 %586 }
 0x314   :  { %v589_v17 = vadd.f32 %v587_v16, %v584_v12 }
 0x316   :  { %591 = vrot.lane.b32.xlu0 %v589_v17, %s1035_s9 }
 0x335   :  { %388 = vadd.xlane.f32.xlu0 %v387_v21 }
 0x339   :  { %615 = vadd.xlane.f32.xlu0 %v399_v52 }
 0x352   :  { %v614_v54 = vpop.xlane.xlu1 %613 }
 0x353   :  { %v618_v22 = vmul.f32 0.03125, %v614_v54 }
 0x355   :  { %v1240_v23 = vsub.f32 %v1231_v13, %v618_v22 }
 0x357   :  { %v622_v4 = vmul.f32 %v1240_v23, %v1240_v23 }
 0x359   :  { %v624_v26 = vsel %vm125_vm1, %v622_v4, 0.0 }
 0x35a   :  { %625 = vadd.xlane.f32.xlu0 %v624_v26  ;;  %v797_v26 = vld [vmem:[%s1301_s14] ss:$0 sm:$0xff] }
 0x388   :  { %v592_v29 = vpop.permute.xlu0 %591 }
 0x389   :  { %v594_v31 = vsel %vm428_vm3, %v510_v30, %v592_v29 }
 0x38a   :  { %v605_v32 = vadd.f32 %v603_v27, %v594_v31  ;;  %v798_v27 = vld [vmem:[%s1299_s12] ss:$0 sm:$0xff] }
 0x38c   :  { %v606_v33 = vsub.f32 0.0, %v605_v32 }
 0x38e   :  { %v607_v34 = vmul.f32 1.442695, %v606_v33 }
 0x390   :  { %918 = vpow2.f32 %v607_v34 }
 0x39a   :  { %v919_v41 = vpop.eup %918 }
 0x39b   :  { %v609_v44 = vadd.f32 1.0, %v919_v41 }
 0x3c2   :  { %v389_v42 = vpop.xlane.xlu0 %388 }
 0x3c3   :  { %920 = vrcp.f32 %v389_v42 }
 0x3c4   :  { %922 = vrcp.f32 %v609_v44 }
 0x3c6   :  { %v616_v46 = vpop.xlane.xlu0 %615 }
 0x3c7   :  { %v619_v47 = vmul.f32 0.03125, %v616_v46 }
 0x3c9   :  { %v621_v53 = vsub.f32 %v1201_v56, %v619_v47 }
 0x3cb   :  { %v623_v57 = vmul.f32 %v621_v53, %v621_v53 }
 0x3cd   :  { %v921_v60 = vpop.eup %920  ;;  %v627_v62 = vsel %vm125_vm1, %v623_v57, 0.0 }
 0x3ce   :  { %v391_v63 = vmul.f32 %v921_v60, %v917_v20  ;;  %628 = vadd.xlane.f32.xlu1 %v627_v62  ;;  %v923_v5 = vpop.eup %922 }
 0x3d0   :  { %v410_v3 = vmul.f32 %v408_v0, %v391_v63 }
 0x3d2   :  { %v612_v6 = vmul.f32 %v923_v5, %v410_v3 }
 0x3d4   :  { %v663_v7 = vrot.slane %v612_v6, %v662_v2 }
 0x3d6   :  { %v664_v9 = vcombine.high %v663_v7, %v663_v7  ;;  %v671_v10 = vrot.slane %v663_v7, %v662_v2 }
 0x3d8   :  { %v678_v11 = vrot.slane %v664_v9, %v662_v2  ;;  %v682_v12 = vrot.slane %v671_v10, %v681_v8 }
 0x3da   :  { %v686_v14 = vrot.slane %v678_v11, %v681_v8  ;;  %v689_v15 = vmul.f32 %v682_v12, %v1231_v13  ;;  %v796_v13 = vld [vmem:[%s1300_s13] ss:$0 sm:$0xff]  ;;  %s994_s13 = scalar_lea.vmem %s769_s16, 256 }
 0x3db   :  { %p995_p10 = scmp.ne.s32.totalorder %s769_s16, %s994_s13  ;;  %p1000_p12 = scmp.lt.s32.totalorder %s994_s13, %s994_s13 }
 0x3dc   :  { %v690_v16 = vmul.f32 %v686_v14, %v1201_v56 }
 0x3dd   :  { %p1001_p13 = por %p1000_p12, %p999_p11 }
 0x3de   :  { %v691_v17 = vpack.c.bf16 %v690_v16, %v689_v15 }
 0x3df   :  { %p1002_p0 = pnand %p1001_p13, %p995_p10 }
 0x3e0   :  { %869 = vmatmul.mubr.msk.bf16.vlgmr.msra.gmra.mrb[8].mxu1 %vm125_vm1, %v691_v17 }
 0x3e7   :  { %v626_v18 = vpop.xlane.xlu0 %625 }
 0x3e8   :  { %v630_v20 = vmul.f32 0.03125, %v626_v18 }
 0x3ea   :  { %v632_v52 = vadd.f32 1e-05, %v630_v20 }
 0x3ec   :  { %924 = vrsqrt.f32 %v632_v52 }
 0x3f6   :  { %v925_v22 = vpop.eup %924 }
 0x3f7   :  { %v636_v4 = vmul.f32 %v925_v22, %v1240_v23 }
 0x3f9   :  { %v645_v25 = vmul.f32 %v796_v13, %v636_v4 }
 0x3fb   :  { %v654_v30 = vadd.f32 %v797_v26, %v645_v25 }
 0x45b   :  { %v629_v19 = vpop.xlane.xlu1 %628 }
 0x45c   :  { %v631_v21 = vmul.f32 0.03125, %v629_v19 }
 0x45e   :  { %v633_v54 = vadd.f32 1e-05, %v631_v21 }
 0x460   :  { %926 = vrsqrt.f32 %v633_v54 }
 0x46a   :  { %v927_v24 = vpop.eup %926 }
 0x46b   :  { %v637_v56 = vmul.f32 %v927_v24, %v621_v53 }
 0x46d   :  { %v646_v28 = vmul.f32 %v796_v13, %v637_v56 }
 0x46f   :  { %v655_v34 = vadd.f32 %v797_v26, %v646_v28 }
 0x4b3   :  { %v752_v29 = vpop.f32.mrb[8].mxu1 }
 0x4b4   :  { %v753_v31 = vadd.f32 %v798_v27, %v752_v29  ;;  %v870_v32 = vpop.f32.mrb[9].mxu1 }
 0x4b5   :  { %v755_v23 = vpop.f32.mrb[10].mxu1 }
 0x4b6   :  { %v759_v33 = vadd.f32 %v753_v31, %v654_v30  ;;  %v756_v35 = vadd.f32 %v798_v27, %v755_v23  ;;  %v871_v36 = vpop.f32.mrb[11].mxu1 }
 0x4b8   :  { %761 = vst.msk [vmem:[#allocation9] sm:$0xff] %vm125_vm1, %v759_v33  ;;  %v760_v37 = vadd.f32 %v756_v35, %v655_v34 }
 0x4ba   :  { %762 = vst.msk [vmem:[#allocation9 + $0x8] sm:$0xff] %vm125_vm1, %v760_v37 }
 0x4bb   :  { %1005 = shalt.err (!%p1002_p0)
}
 0x4bc   :  { %s1006_s17 = scalar_lea.hbm %s1302_s15, 256 }
 0x4bd   :  { %p1007_p1 = scmp.ne.s32.totalorder %s1302_s15, %s1006_s17  ;;  %p1010_p2 = scmp.lt.u32.totalorder %s1006_s17, %s1302_s15 }
 0x4bf   :  { %p1012_p3 = pnand %p1010_p2, %p1007_p1 }
 0x4c1   :  { %1015 = shalt.err (!%p1012_p3)
}
 0x4c2   :  { %774 = dma.vmem_to_hbm [thread:$0]  %s769_s16, 256, %s1302_s15, [#allocation5], %s1023_s29, %s1023_s29, %s1024_s30  }
 0x4c3   :  { %1020 = dma.done.wait [#allocation5], 256  }
 0x4c4   :  { %1021 = vsyncadd [#allocation5], 4294967040 }
 0x4c5   :  { %778 = vsyncpa [#allocation4], 1 }
 0x4c6   :  { %779 = vsyncpa [#allocation7], 1 }
 0x4c7   :  { %780 = vsyncpa [#allocation5], 1 }

</bundles_post_ra>
